<compile_context>
chip_gen: v7x
topology: tpu7x:2x2x1
jax: 0.10.0
libtpu: 0.0.40
codegen_flags: <defaults>
</compile_context>

<pallas_src>
import functools

import jax
import jax.numpy as jnp
from jax import lax
from jax.experimental import pallas as pl
from jax.experimental.pallas import tpu as pltpu

_LANES = 128
_SUBLANES = 8


def _ce_label_smooth_kernel(pred_ref, tgt_ref, out_ref, *, epsilon, num_classes,
                            batch, tile_rows, b_is_ragged):
    # pred_ref: (TB, K) logits (f32 or bf16)     tgt_ref: (TB, 1) int32
    # out_ref : (1, 128) f32 partial-sum block (tile loss in lane 0)
    x = pred_ref[...].astype(jnp.float32)                       # (TB, K) f32
    tb, k = x.shape

    labels = tgt_ref[...]                                       # (TB, 1) int32
    lane_ids = lax.broadcasted_iota(jnp.int32, (1, k), 1)       # (1, K)
    is_tgt = lane_ids == labels                                 # (TB, K) bool

    m = jnp.max(x, axis=1, keepdims=True)                       # (TB, 1)
    shifted = x - m                                             # (TB, K)
    sumexp = jnp.sum(jnp.exp(shifted), axis=1, keepdims=True)   # (TB, 1)
    lse = jnp.log(sumexp)                                       # (TB, 1)

    # s_w = sum_k w_k * shifted_k  with  w_k = eps/K + (1-eps)*[k == target]
    row_sum = jnp.sum(shifted, axis=1, keepdims=True)           # (TB, 1)
    tgt_val = jnp.sum(jnp.where(is_tgt, shifted, 0.0),
                      axis=1, keepdims=True)                    # (TB, 1)
    base_w = jnp.float32(epsilon / num_classes)
    row_loss = lse - (base_w * row_sum
                      + jnp.float32(1.0 - epsilon) * tgt_val)   # (TB, 1)

    if b_is_ragged:
        # Last batch tile reads past the array; those rows hold unspecified
        # values (possibly Inf/NaN).  A select (never a multiply) zeroes them.
        row_ids = (pl.program_id(0) * tile_rows
                   + lax.broadcasted_iota(jnp.int32, (tb, 1), 0))
        row_loss = jnp.where(row_ids < batch, row_loss, 0.0)

    tile_loss = jnp.sum(row_loss)                               # scalar f32
    lane = lax.broadcasted_iota(jnp.int32, (1, _LANES), 1)
    out_ref[...] = jnp.where(lane == 0, tile_loss, jnp.float32(0.0))


def _choose_tile_rows(b, k, in_itemsize):
    # Peak VMEM per grid step ~= 2 double-buffered input blocks (input dtype)
    # + ~4 live (TB, K) f32 temporaries (x, shifted, exp, masked-select).
    # 40 MiB budget under a 48 MiB scoped limit -> safe on v7x (64 MiB physical
    # VMEM) and still multi-MiB blocks (85%+ HBM roofline regime) on v5e/v6e.
    n_live_f32_temps = 4
    budget_bytes = 40 * 1024 * 1024
    per_row_bytes = k * (2 * in_itemsize + n_live_f32_temps * 4)
    tb = budget_bytes // max(per_row_bytes, 1)
    tb = (tb // _SUBLANES) * _SUBLANES
    tb = max(_SUBLANES, min(tb, pl.cdiv(b, _SUBLANES) * _SUBLANES))
    if b > _SUBLANES:
        # Guarantee >= 2 grid steps so the "parallel" batch axis can shard
        # across both TensorCores on v7x (harmless ~0.35 us on 1-TC parts).
        two_tile_cap = pl.cdiv(pl.cdiv(b, 2), _SUBLANES) * _SUBLANES
        tb = min(tb, max(_SUBLANES, two_tile_cap))
    return tb


def cross_entropy_label_smooth(pred, target, num_classes, epsilon=0.1,
                               tile_rows=None):
    """pred: (B, K) logits (f32 or bf16); target: (B,) int class indices.

    Returns the scalar f32 label-smoothed cross entropy loss.
    """
    b, k = pred.shape
    assert k == num_classes

    in_itemsize = jnp.dtype(pred.dtype).itemsize
    if tile_rows is None:
        tile_rows = _choose_tile_rows(b, k, in_itemsize)
    tile_rows = max(_SUBLANES, (int(tile_rows) // _SUBLANES) * _SUBLANES)
    num_tiles = pl.cdiv(b, tile_rows)

    tgt = target.reshape(b, 1).astype(jnp.int32)

    kernel = functools.partial(
        _ce_label_smooth_kernel,
        epsilon=float(epsilon),
        num_classes=int(num_classes),
        batch=int(b),
        tile_rows=int(tile_rows),
        b_is_ragged=(b % tile_rows != 0),
    )

    partials = pl.pallas_call(
        kernel,
        out_shape=jax.ShapeDtypeStruct((1, num_tiles * _LANES), jnp.float32),
        grid=(num_tiles,),
        in_specs=[
            # Last dim == full array dim K -> no (8,128) constraint, no pad.
            pl.BlockSpec((tile_rows, k), lambda i: (i, 0)),      # logits tile
            pl.BlockSpec((tile_rows, 1), lambda i: (i, 0)),      # target tile
        ],
        out_specs=pl.BlockSpec((1, _LANES), lambda i: (0, i)),   # per-tile partial
        compiler_params=pltpu.CompilerParams(
            dimension_semantics=("parallel",),
            vmem_limit_bytes=48 * 1024 * 1024,
        ),
    )(pred, tgt)

    # mean over the *global* batch, sum over classes (non-lane-0 entries are 0).
    return jnp.sum(partials) / jnp.float32(b)


def _reference(pred, target, num_classes, epsilon=0.1):
    # Pure-JAX reference mirroring the PyTorch forward.
    log_probs = jax.nn.log_softmax(pred.astype(jnp.float32), axis=1)
    one_hot = jax.nn.one_hot(target, num_classes, dtype=jnp.float32)
    smoothed = (1.0 - epsilon) * one_hot + epsilon / num_classes
    return jnp.sum(jnp.mean(-smoothed * log_probs, axis=0))


if __name__ == "__main__":
    # Small, deliberately "ragged" shapes: B=20 is not a multiple of the 8-row
    # sublane granule and K=37 is not a multiple of 128 lanes, exercising the
    # no-pad class axis, the multi-tile grid, and the ragged-last-tile mask.
    num_classes = 37
    batch = 20
    epsilon = 0.1

    key = jax.random.PRNGKey(0)
    k_pred, k_tgt = jax.random.split(key)
    pred = jax.random.normal(k_pred, (batch, num_classes), dtype=jnp.float32)
    target = jax.random.randint(k_tgt, (batch,), 0, num_classes, dtype=jnp.int32)

    ref = _reference(pred, target, num_classes, epsilon)

    # 1) Auto tile size (>=2 tiles so v7x megacore sharding applies).
    loss_auto = cross_entropy_label_smooth(pred, target, num_classes, epsilon)
    loss_auto = jax.block_until_ready(loss_auto)
    assert jnp.allclose(loss_auto, ref, atol=1e-5, rtol=1e-5), (loss_auto, ref)

    # 2) Explicit tile_rows=8 -> 3 batch tiles (grid=(3,)), last tile ragged.
    loss_t8 = cross_entropy_label_smooth(pred, target, num_classes, epsilon,
                                         tile_rows=8)
    loss_t8 = jax.block_until_ready(loss_t8)
    assert jnp.allclose(loss_t8, ref, atol=1e-5, rtol=1e-5), (loss_t8, ref)

    print("KERNEL_OK")
</pallas_src>

<mosaic_0001>
module attributes {stable_mosaic.version = 11 : i64} {
  func.func @_ce_label_smooth_kernel(%arg0: i32, %arg1: memref<16x37xf32, #tpu.memory_space<vmem>>, %arg2: memref<16x1xi32, #tpu.memory_space<vmem>>, %arg3: memref<1x128xf32, #tpu.memory_space<vmem>>) attributes {dimension_semantics = [#tpu.dimension_semantics<parallel>], iteration_bounds = array<i64: 2>, scalar_prefetch = 0 : i64, scratch_operands = 0 : i64, tpu.core_type = #tpu.core_type<tc>, window_params = [{transform_indices = @transform_0, window_bounds = array<i64: 16, 37>}, {transform_indices = @transform_1, window_bounds = array<i64: 16, 1>}, {transform_indices = @transform_2, window_bounds = array<i64: 1, 128>}]} {
    %c0 = arith.constant 0 : index
    %c0_0 = arith.constant 0 : index
    %0 = vector.load %arg1[%c0, %c0_0] : memref<16x37xf32, #tpu.memory_space<vmem>>, vector<16x37xf32>
    %c0_1 = arith.constant 0 : index
    %c0_2 = arith.constant 0 : index
    %1 = vector.load %arg2[%c0_1, %c0_2] : memref<16x1xi32, #tpu.memory_space<vmem>>, vector<16x1xi32>
    %2 = tpu.iota {dimensions = array<i32: 1>} : vector<1x37xi32>
    %3 = vector.broadcast %2 : vector<1x37xi32> to vector<16x37xi32>
    %4 = vector.broadcast %1 : vector<16x1xi32> to vector<16x37xi32>
    %5 = arith.cmpi eq, %3, %4 : vector<16x37xi32>
    %cst = arith.constant dense<0xFF800000> : vector<16xf32>
    %6 = vector.multi_reduction <maximumf>, %0, %cst [1] : vector<16x37xf32> to vector<16xf32>
    %7 = vector.shape_cast %6 : vector<16xf32> to vector<16x1xf32>
    %8 = vector.broadcast %7 : vector<16x1xf32> to vector<16x37xf32>
    %9 = arith.subf %0, %8 : vector<16x37xf32>
    %10 = math.exp %9 : vector<16x37xf32>
    %cst_3 = arith.constant dense<0.000000e+00> : vector<16xf32>
    %11 = vector.multi_reduction <add>, %10, %cst_3 [1] : vector<16x37xf32> to vector<16xf32>
    %12 = vector.shape_cast %11 : vector<16xf32> to vector<16x1xf32>
    %13 = math.log %12 : vector<16x1xf32>
    %cst_4 = arith.constant dense<0.000000e+00> : vector<16xf32>
    %14 = vector.multi_reduction <add>, %9, %cst_4 [1] : vector<16x37xf32> to vector<16xf32>
    %15 = vector.shape_cast %14 : vector<16xf32> to vector<16x1xf32>
    %cst_5 = arith.constant 0.000000e+00 : f32
    %16 = vector.broadcast %cst_5 : f32 to vector<16x37xf32>
    %17 = arith.select %5, %9, %16 : vector<16x37xi1>, vector<16x37xf32>
    %cst_6 = arith.constant dense<0.000000e+00> : vector<16xf32>
    %18 = vector.multi_reduction <add>, %17, %cst_6 [1] : vector<16x37xf32> to vector<16xf32>
    %19 = vector.shape_cast %18 : vector<16xf32> to vector<16x1xf32>
    %cst_7 = arith.constant 0.00270270277 : f32
    %20 = vector.broadcast %cst_7 : f32 to vector<16x1xf32>
    %21 = arith.mulf %20, %15 : vector<16x1xf32>
    %cst_8 = arith.constant 0.899999976 : f32
    %22 = vector.broadcast %cst_8 : f32 to vector<16x1xf32>
    %23 = arith.mulf %22, %19 : vector<16x1xf32>
    %24 = arith.addf %21, %23 : vector<16x1xf32>
    %25 = arith.subf %13, %24 : vector<16x1xf32>
    %c16_i32 = arith.constant 16 : i32
    %26 = arith.muli %arg0, %c16_i32 : i32
    %27 = tpu.iota {dimensions = array<i32: 0>} : vector<16x1xi32>
    %28 = vector.broadcast %26 : i32 to vector<16x1xi32>
    %29 = arith.addi %28, %27 : vector<16x1xi32>
    %c20_i32 = arith.constant 20 : i32
    %30 = vector.broadcast %c20_i32 : i32 to vector<16x1xi32>
    %31 = arith.cmpi slt, %29, %30 : vector<16x1xi32>
    %cst_9 = arith.constant 0.000000e+00 : f32
    %32 = vector.broadcast %cst_9 : f32 to vector<16x1xf32>
    %33 = arith.select %31, %25, %32 : vector<16x1xi1>, vector<16x1xf32>
    %34 = vector.shape_cast %33 : vector<16x1xf32> to vector<1x16x1xf32>
    %cst_10 = arith.constant dense<0.000000e+00> : vector<1xf32>
    %35 = vector.multi_reduction <add>, %34, %cst_10 [1, 2] : vector<1x16x1xf32> to vector<1xf32>
    %36 = vector.shape_cast %35 : vector<1xf32> to vector<1x1x1xf32>
    %37 = vector.extract %36[0, 0, 0] : f32 from vector<1x1x1xf32>
    %38 = tpu.iota {dimensions = array<i32: 1>} : vector<1x128xi32>
    %c0_i32 = arith.constant 0 : i32
    %39 = vector.broadcast %c0_i32 : i32 to vector<1x128xi32>
    %40 = arith.cmpi eq, %38, %39 : vector<1x128xi32>
    %cst_11 = arith.constant 0.000000e+00 : f32
    %41 = vector.broadcast %37 : f32 to vector<1x128xf32>
    %42 = vector.broadcast %cst_11 : f32 to vector<1x128xf32>
    %43 = arith.select %40, %41, %42 : vector<1x128xi1>, vector<1x128xf32>
    %c0_12 = arith.constant 0 : index
    %c0_13 = arith.constant 0 : index
    %44 = vector.load %arg3[%c0_12, %c0_13] : memref<1x128xf32, #tpu.memory_space<vmem>>, vector<1x128xf32>
    tpu.vector_store %arg3[%c0_12, %c0_13], %43 {strides = array<i32>} : memref<1x128xf32, #tpu.memory_space<vmem>>, vector<1x128xf32>,
    return
  }
  func.func @transform_0(%arg0: i32) -> (i32, i32) {
    %c0_i32 = arith.constant 0 : i32
    %c0_i32_0 = arith.constant 0 : i32
    return %arg0, %c0_i32 : i32, i32
  }
  func.func @transform_1(%arg0: i32) -> (i32, i32) {
    %c0_i32 = arith.constant 0 : i32
    %c0_i32_0 = arith.constant 0 : i32
    return %arg0, %c0_i32 : i32, i32
  }
  func.func @transform_2(%arg0: i32) -> (i32, i32) {
    %c0_i32 = arith.constant 0 : i32
    %c0_i32_0 = arith.constant 0 : i32
    return %c0_i32, %arg0 : i32, i32
  }
}

</mosaic_0001>

<bundles_post_ra>
// kernel: tpu_custom_call.1
= control target key start
LH: loop header
LB: loop body
LE: loop exit
PB: predicated region body
PF: predicated region fallthrough
CT: control target
= control target key end

     0   :  { %7 = vsyncpa [#allocation3], 0  ;;  %s636_s0 = inlined_call_operand.vmem [shape: f32[20,37], index: 0, kind: input, shape index: {}]   ;;  %s637_s1 = inlined_call_operand.vmem [shape: s32[20,1], index: 1, kind: input, shape index: {}]   ;;  %s638_s2 = inlined_call_operand.hbm [shape: f32[1,256], index: 2, kind: output, shape index: {}]  }
   0x1   :  { %9 = vsyncpa [#allocation3 + $0x1], 0  ;;  %s517_s9 = smov 0   ;;  %s519_s10 = smov 0  }
   0x2   :  { %s521_s11 = smov 0   ;;  %s523_s12 = smov 0  }
   0x3 LB: > { %s538_s13 = sadd.s32 4294967295, %s498_s12   ;;  %s372_s14 = sadd.s32 4294967294, %s498_s12   ;;  %s498_s12 = sphi %s523_s12, %s644_s12   ;;  %s494_s11 = sphi %s521_s11, %s643_s11   ;;  %s490_s10 = sphi %s519_s10, %s642_s10   ;;  %s486_s9 = sphi %s517_s9, %s641_s9  }
   0x4   : > { %s542_s15 = sadd.s32 1, %s498_s12   ;;  %s74_s16 = sadd.s32 1, %s494_s11 }
   0x5   : > { %s71_s17 = ssub.s32 %s498_s12, %s542_s15  ;;  %p84_p0 = scmp.ne.s32.totalorder %s494_s11, %s490_s10 }
   0x6   : > { %p72_p1 = scmp.eq.s32.totalorder %s71_s17, 0  ;;  %p85_p2 = scmp.eq.s32.totalorder %s538_s13, 1 }
   0x7   : > { %p90_p3 = scmp.ne.s32.totalorder %s490_s10, %s486_s9  ;;  %p91_p4 = scmp.eq.s32.totalorder %s372_s14, 1 }
   0x8   : > { %s553_s18 = scalar_select %p72_p1, %s494_s11, %s74_s16  }
   0x9   : > { %p555_p5 = por %p85_p2, %p84_p0  ;;  %p559_p6 = por %p91_p4, %p90_p3 }
   0xa   : > { %p375_p7 = scmp.ge.s32.totalorder %s498_s12, 1  ;;  %p143_p8 = scmp.lt.s32.totalorder %s498_s12, 3 }
   0xc   : > { %p144_p9 = pnand %p375_p7, %p143_p8 }
   0xd   : > { %s376_s21 = sshll.u32 (!%p144_p9), %s538_s13, 1  ;;  %v500_v0 = vmov (!%p144_p9), 0   ;;  %vm219_vm0 = vcmask (!%p144_p9), 302080   ;;  %v209_v13 = vlaneseq (!%p144_p9)  ;;  %s380_s29 = sshll.u32 (!%p144_p9), %s538_s13, 4  ;;  %vm275_vm5 = vcmask (!%p144_p9), 7168  }
   0xe   : > { %147 = sbr.rel (%p144_p9) target bundleno = 572 (0x23c), region = 28  ;;  %p182_p10 = scmp.lt.s32.totalorder (!%p144_p9), %s376_s21, 2  ;;  %426 = vset.pattern.permute.xlu1 (!%p144_p9), %v500_v0  ;;  %427 = vset.pattern.permute.xlu0 (!%p144_p9), %v500_v0  ;;  %v268_v32 = vstv (!%p144_p9), %s380_s29 }
   0xf   : > { %v575_v16 = vand.u32 (!%p144_p9), 127, %v209_v13  ;;  %v266_v31 = vshrl.u32 (!%p144_p9), %v209_v13, 7  ;;  %s175_s30 = sand.u32 (!%p144_p9), 1, %s490_s10   ;;  %s594_s8 = scalar_lea.hbm (!%p144_p9), %s638_s2, %s380_s29 }
  0x10   : > { %s176_s3 = scalar_lea.vmem (!%p144_p9), [#allocation2], %s175_s30  ;;  %s293_s14 = scalar_lea.sflag (!%p144_p9), [#allocation3], %s175_s30 }
  0x11   : > { %v267_v35 = vadd.s32 (!%p144_p9), 8, %v266_v31  ;;  %v269_v38 = vadd.s32 (!%p144_p9), %v268_v32, %v266_v31  ;;  %s305_s4 = sshll.u32 (!%p144_p9), %s176_s3, 4  ;;  %vm288_vm6 = vcmp.eq.s32.totalorder (!%p144_p9), %v575_v16, 0  ;;  %s501_s17 = smov (!%p144_p9), [#allocation2]   ;;  %s596_s4 = int_to_ptr.vmem [resolvable:$true] %s305_s4 }
  0x12   : > { %s436_s16 = scalar_lea.vmem (!%p144_p9), %s596_s4, 16  ;;  %s440_s13 = sshll.u32 (!%p144_p9), %s501_s17, 4  ;;  %s441_s13 = int_to_ptr.vmem [resolvable:$false] %s440_s13 }
  0x13   : > { %v270_v43 = vadd.s32 (!%p144_p9), %v268_v32, %v267_v35  ;;  %vm271_vm3 = vcmp.lt.s32.totalorder (!%p144_p9), %v269_v38, 20  ;;  %p437_p11 = scmp.ne.s32.totalorder (!%p144_p9), %s596_s4, %s436_s16  ;;  %p443_p0 = scmp.lt.s32.totalorder (!%p144_p9), %s596_s4, %s441_s13 }
  0x15   : > { %s646_s21 = smov (!%p182_p10, %s376_s21), 2  ;;  %vm272_vm4 = vcmp.lt.s32.totalorder %v270_v43, 20  ;;  %p438_p12 = pnand %p437_p11, %p555_p5 }
  0x16   : > { %s377_s22 = sshll.u32 %s646_s21, 3  ;;  %s442_s21 = scalar_lea.vmem %s441_s13, 32 }
  0x17   : > { %s185_s25 = scalar_lea.vmem %s636_s0, %s377_s22  ;;  %s199_s28 = scalar_lea.vmem %s637_s1, %s377_s22 }
  0x18   : > { %v205_v1 = vld [vmem:[%s185_s25] sm:$0xff]  ;;  %v206_v2 = vld [vmem:[%s185_s25 + $0x8] sm:$0xff]  ;;  %p439_p13 = pneg %p438_p12  ;;  %p444_p1 = scmp.lt.s32.totalorder %s442_s21, %s436_s16 }
  0x19   : > { %v207_v3 = vld [vmem:[%s199_s28] sm:$0xff]  ;;  %v220_v4 = vsel %vm219_vm0, %v205_v1, -inf  ;;  %v208_v5 = vld [vmem:[%s199_s28 + $0x8] sm:$0xff]  ;;  %v223_v6 = vsel %vm219_vm0, %v206_v2, -inf }
  0x1a   : > { %212 = vperm.xlu1 %426, %v207_v3   ;;  %221 = vmax.xlane.f32.xlu0 %v220_v4  ;;  %p445_p2 = por %p444_p1, %p443_p0 }
  0x1c   : > { %p446_p3 = pnand %p445_p2, %p439_p13 }
  0x1e   : > { %215 = vperm.xlu1 %426, %v208_v5   ;;  %224 = vmax.xlane.f32.xlu0 %v223_v6 }
  0x99   : > { %v213_v18 = vpop.permute.xlu1 %212 }
  0x9a   : > { %vm217_vm1 = vcmp.eq.s32.totalorder %v575_v16, %v213_v18 }
  0x9d   : > { %v216_v21 = vpop.permute.xlu1 %215 }
  0x9e   : > { %vm218_vm2 = vcmp.eq.s32.totalorder %v575_v16, %v216_v21 }
  0xa7   : > { %v222_v7 = vpop.xlane.xlu0 %221 }
  0xa8   : > { %v226_v8 = vsub.f32 %v205_v1, %v222_v7 }
  0xaa   : > { %v228_v9 = vmul.f32 1.442695, %v226_v8  ;;  %v242_v19 = vsel %vm219_vm0, %v226_v8, 0.0  ;;  %v248_v23 = vsel %vm217_vm1, %v226_v8, 0.0 }
  0xab   : > { %v225_v10 = vpop.xlane.xlu0 %224  ;;  %v250_v24 = vsel %vm219_vm0, %v248_v23, 0.0 }
  0xac   : > { %428 = vpow2.f32 %v228_v9  ;;  %v227_v11 = vsub.f32 %v206_v2, %v225_v10 }
  0xae   : > { %v230_v12 = vmul.f32 1.442695, %v227_v11  ;;  %v245_v22 = vsel %vm219_vm0, %v227_v11, 0.0  ;;  %v249_v25 = vsel %vm218_vm2, %v227_v11, 0.0 }
  0xaf   : > { %v253_v26 = vsel %vm219_vm0, %v249_v25, 0.0 }
  0xb0   : > { %430 = vpow2.f32 %v230_v12 }
  0xb6   : > { %v429_v14 = vpop.eup %428 }
  0xb7   : > { %v232_v15 = vsel %vm219_vm0, %v429_v14, 0.0 }
  0xb8   : > { %233 = vadd.xlane.f32.xlu0 %v232_v15 }
  0xba   : > { %v431_v17 = vpop.eup %430 }
  0xbb   : > { %v235_v20 = vsel %vm219_vm0, %v431_v17, 0.0 }
  0xbc   : > { %243 = vadd.xlane.f32.xlu0 %v242_v19  ;;  %236 = vadd.xlane.f32.xlu1 %v235_v20 }
  0xc0   : > { %246 = vadd.xlane.f32.xlu0 %v245_v22 }
  0xc4   : > { %251 = vadd.xlane.f32.xlu0 %v250_v24 }
  0xc8   : > { %254 = vadd.xlane.f32.xlu0 %v253_v26 }
 0x145   : > { %v234_v27 = vpop.xlane.xlu0 %233 }
 0x146   : > { %432 = vlog2.f32 %v234_v27 }
 0x149   : > { %v244_v28 = vpop.xlane.xlu0 %243  ;;  %v237_v29 = vpop.xlane.xlu1 %236 }
 0x14a   : > { %434 = vlog2.f32 %v237_v29  ;;  %v256_v36 = vmul.f32 0.0027027028, %v244_v28 }
 0x14d   : > { %v247_v30 = vpop.xlane.xlu0 %246 }
 0x14e   : > { %v257_v45 = vmul.f32 0.0027027028, %v247_v30 }
 0x150   : > { %v433_v33 = vpop.eup %432 }
 0x151   : > { %v252_v34 = vpop.xlane.xlu0 %251  ;;  %v239_v40 = vmul.f32 0.6931472, %v433_v33 }
 0x152   : > { %v258_v37 = vmul.f32 0.9, %v252_v34 }
 0x154   : > { %v435_v39 = vpop.eup %434  ;;  %v260_v41 = vadd.f32 %v258_v37, %v256_v36 }
 0x155   : > { %v255_v42 = vpop.xlane.xlu0 %254  ;;  %v241_v44 = vmul.f32 0.6931472, %v435_v39 }
 0x156   : > { %v262_v46 = vsub.f32 %v239_v40, %v260_v41  ;;  %v259_v47 = vmul.f32 0.9, %v255_v42 }
 0x158   : > { %v261_v48 = vadd.f32 %v259_v47, %v257_v45  ;;  %v273_v50 = vsel %vm271_vm3, %v262_v46, 0.0 }
 0x159   : > { %v276_v52 = vsel %vm275_vm5, %v273_v50, 0.0 }
 0x15a   : > { %v263_v49 = vsub.f32 %v241_v44, %v261_v48 }
 0x15c   : > { %v274_v51 = vsel %vm272_vm4, %v263_v49, 0.0 }
 0x15d   : > { %v277_v53 = vsel %vm275_vm5, %v274_v51, 0.0 }
 0x15e   : > { %v278_v54 = vadd.f32 %v277_v53, %v276_v52 }
 0x160   : > { %279 = vadd.xlane.f32.xlu0 %v278_v54 }
 0x1ed   : > { %v280_v55 = vpop.xlane.xlu0 %279 }
 0x1ee   : > { %v281_v56 = vrot.slane %v280_v55, 4 }
 0x1f0   : > { %v282_v57 = vadd.f32 %v281_v56, %v280_v55 }
 0x1f2   : > { %v283_v58 = vrot.slane %v282_v57, 2 }
 0x1f4   : > { %v284_v59 = vadd.f32 %v283_v58, %v282_v57 }
 0x1f6   : > { %v285_v60 = vrot.slane %v284_v59, 1 }
 0x1f8   : > { %v286_v61 = vadd.f32 %v285_v60, %v284_v59 }
 0x1fa   : > { %384 = vpush %v286_v61 }
 0x22b   : > { %s385_s5 = spop %384 }
 0x22c   : > { %v289_v62 = vstv %s385_s5 }
 0x22d   : > { %v290_v63 = vsel %vm288_vm6, %v289_v62, 0.0 }
 0x22e   : > { %291 = vst [vmem:[%s176_s3] sm:$0x1] %v290_v63 }
 0x22f   : > { %449 = shalt.err (!%p446_p3)
}
 0x230   : > { %s450_s22 = scalar_lea.hbm %s594_s8, 16  ;;  %s454_s25 = scalar_lea.hbm %s638_s2, 32 }
 0x231   : > { %p451_p4 = scmp.ne.s32.totalorder %s594_s8, %s450_s22  ;;  %p455_p9 = scmp.lt.u32.totalorder %s594_s8, %s638_s2 }
 0x232   : > { %p456_p10 = scmp.lt.u32.totalorder %s454_s25, %s450_s22  ;;  %p458_p12 = scmp.lt.u32.totalorder %s450_s22, %s594_s8 }
 0x233   : > { %p452_p7 = pnand %p451_p4, %p555_p5 }
 0x234   : > { %p457_p11 = por %p456_p10, %p455_p9 }
 0x235   : > { %p453_p8 = pneg %p452_p7 }
 0x236   : > { %p459_p13 = por %p458_p12, %p457_p11 }
 0x238   : > { %p460_p0 = pnand %p459_p13, %p453_p8 }
 0x23a   : > { %463 = shalt.err (!%p460_p0)
}
 0x23b   : > { %386 = dma.vmem_to_hbm [thread:$0]  (%p555_p5), %s596_s4, 16, %s594_s8, %s293_s14  }
 0x23c PF: > { %p392_p1 = scmp.ge.s32.totalorder %s498_s12, 2  ;;  %s317_s28 = sand.u32 1, %s486_s9  }
 0x23d   : > { %s318_s29 = scalar_lea.sflag [#allocation3], %s317_s28 }
 0x23e   : > { %p389_p2 = pnand %p392_p1, %p559_p6 }
 0x240   : > { %481 = dma.done.wait (!%p389_p2), %s318_s29, 16  }
 0x241   : > { %483 = vsyncadd (!%p389_p2), %s318_s29, 4294967280  ;;  %p12_p3 = scmp.ge.s32.totalorder %s542_s15, 4   ;;  %s641_s9 = smov %s490_s10 }
 0x242   : > { %s642_s10 = smov %s494_s11  ;;  %s643_s11 = smov %s553_s18 }
 0x243   : > { %s644_s12 = smov %s542_s15  ;;  %14 = sbr.rel (!%p12_p3) target bundleno = 3 (0x3), region = 66 }
 0x24a   :  { %322 = vsyncpa [#allocation3], 1 }
 0x24b   :  { %324 = vsyncpa [#allocation3 + $0x1], 1 }

</bundles_post_ra>
